<compile_context>
chip_gen: v7x
topology: tpu7x:2x2x1
jax: 0.10.0
libtpu: 0.0.40
codegen_flags: <defaults>
</compile_context>

<pallas_src>
import numpy as np
import jax
import jax.numpy as jnp
from jax.experimental import pallas as pl
from jax.experimental.pallas import tpu as pltpu

IN_DIM, H1, H2, H3, N_CLASS = 37, 256, 256, 128, 173
EPS = 1e-5

DP = 128                    # padded input-feature width (lane multiple)
CP = 256                    # padded class width -> unmasked 256-lane stores
MAX_TILE = 1024             # max batch-tile rows (sweepable 512-2048)
COMPUTE_DTYPE = jnp.bfloat16  # matmul operand dtype (f32 MXU accumulation)
OUT_DTYPE = jnp.bfloat16      # logits dtype; halves HBM writeback


def _pad_to(n, m):
    return ((n + m - 1) // m) * m


def _cdiv(a, b):
    return -(-a // b)


# ----------------------------- Pallas kernel --------------------------------
def mlp_kernel(x_ref, w1_ref, b1_ref, w2_ref, b2_ref, w3_ref, b3_ref,
               wo_ref, bo_ref, o_ref):
    cdt = w1_ref.dtype  # bf16 matmul operands; biases / accumulation in f32
    # fc1 (x*2-1, input_bn, bn1 pre-folded into w1/b1) -> relu ; dropout = id
    h = jnp.dot(x_ref[...], w1_ref[...],
                preferred_element_type=jnp.float32) + b1_ref[...]
    h = jnp.maximum(h, 0.0)
    # fc2 (+bn2) -> relu
    h = jnp.dot(h.astype(cdt), w2_ref[...],
                preferred_element_type=jnp.float32) + b2_ref[...]
    h = jnp.maximum(h, 0.0)
    # fc3 (+bn3) -> relu
    h = jnp.dot(h.astype(cdt), w3_ref[...],
                preferred_element_type=jnp.float32) + b3_ref[...]
    h = jnp.maximum(h, 0.0)
    # output linear -> bf16 store (halves writeback bytes)
    o = jnp.dot(h.astype(cdt), wo_ref[...],
                preferred_element_type=jnp.float32) + bo_ref[...]
    o_ref[...] = o.astype(o_ref.dtype)


def _build_call(Bp, batch_tile):
    n_steps = Bp // batch_tile
    flops = 2 * Bp * (DP * H1 + H1 * H2 + H2 * H3 + H3 * CP)
    w_bytes = 2 * (DP * H1 + H1 * H2 + H2 * H3 + H3 * CP) \
        + 4 * (H1 + H2 + H3 + CP)
    bytes_accessed = 2 * Bp * DP + 2 * Bp * CP + w_bytes

    def wspec(shape):
        # Grid-invariant operand: index_map -> (0,0); pipeline re-uses the
        # resident block (no re-DMA per step). Default buffering.
        return pl.BlockSpec(shape, lambda i: (0, 0))

    return pl.pallas_call(
        mlp_kernel,
        out_shape=jax.ShapeDtypeStruct((Bp, CP), OUT_DTYPE),
        grid_spec=pltpu.PrefetchScalarGridSpec(
            num_scalar_prefetch=0,
            grid=(n_steps,),
            in_specs=[
                pl.BlockSpec((batch_tile, DP), lambda i: (i, 0)),   # x tile
                wspec((DP, H1)), wspec((1, H1)),                    # w1, b1
                wspec((H1, H2)), wspec((1, H2)),                    # w2, b2
                wspec((H2, H3)), wspec((1, H3)),                    # w3, b3
                wspec((H3, CP)), wspec((1, CP)),                    # wo, bo
            ],
            out_specs=pl.BlockSpec((batch_tile, CP), lambda i: (i, 0)),
        ),
        compiler_params=pltpu.CompilerParams(
            dimension_semantics=("parallel",)),
        cost_estimate=pl.CostEstimate(
            flops=flops, transcendentals=0, bytes_accessed=bytes_accessed),
    )


# ----------------------------- parameter setup -------------------------------
def init_params(key):
    """Deterministic init mirroring the PyTorch module __init__."""
    k1, k2, k3, k4 = jax.random.split(key, 4)

    def kaiming(k, fan_in, fan_out):
        # nn.init.kaiming_normal_ default: fan_in, gain=sqrt(2); torch (out, in)
        std = float(np.sqrt(2.0 / fan_in))
        return jax.random.normal(k, (fan_out, fan_in), jnp.float32) * std

    def bn(d):
        # gamma, beta, running_mean, running_var  (fresh nn.BatchNorm1d init)
        return (jnp.ones((d,), jnp.float32), jnp.zeros((d,), jnp.float32),
                jnp.zeros((d,), jnp.float32), jnp.ones((d,), jnp.float32))

    return dict(
        W1=kaiming(k1, IN_DIM, H1), b1=jnp.zeros((H1,), jnp.float32),
        W2=kaiming(k2, H1, H2),     b2=jnp.zeros((H2,), jnp.float32),
        W3=kaiming(k3, H2, H3),     b3=jnp.zeros((H3,), jnp.float32),
        Wo=kaiming(k4, H3, N_CLASS), bo=jnp.zeros((N_CLASS,), jnp.float32),
        bn0=bn(IN_DIM), bn1=bn(H1), bn2=bn(H2), bn3=bn(H3),
    )


def _fold_linear_bn(W, b, bn_params):
    """Fold eval-mode BatchNorm after a Linear into the Linear weights.
    Returns (W_eff[in, out], b_eff[out]) for x @ W_eff + b_eff."""
    gamma, beta, mu, var = bn_params
    scale = gamma / jnp.sqrt(var + EPS)
    W_eff = (W * scale[:, None]).T          # torch (out, in) -> (in, out)
    b_eff = (b - mu) * scale + beta
    return W_eff, b_eff


def prepare_params(params, compute_dtype=COMPUTE_DTYPE):
    """One-time preprocessing: fold eval-mode BatchNorms and the leading
    x*2-1 into the Linears, pad to lane multiples, cast matmul operands."""
    g0, be0, mu0, var0 = params["bn0"]
    s0 = g0 / jnp.sqrt(var0 + EPS)          # input-BN scale
    t0 = be0 - mu0 * s0                     # input-BN shift

    w1, b1 = _fold_linear_bn(params["W1"], params["b1"], params["bn1"])
    # (x*2-1)*s0 + t0 = x*(2*s0) + (t0 - s0), folded into fc1:
    b1 = b1 + (t0 - s0) @ w1
    w1 = w1 * (2.0 * s0)[:, None]
    w2, b2 = _fold_linear_bn(params["W2"], params["b2"], params["bn2"])
    w3, b3 = _fold_linear_bn(params["W3"], params["b3"], params["bn3"])
    wo, bo = params["Wo"].T, params["bo"]

    # pad feature/class dims to lane multiples, cast matmul operands to bf16
    w1p = jnp.zeros((DP, H1), jnp.float32).at[:IN_DIM, :].set(w1)
    wop = jnp.zeros((H3, CP), jnp.float32).at[:, :N_CLASS].set(wo)
    bop = jnp.zeros((1, CP), jnp.float32).at[0, :N_CLASS].set(bo)

    return dict(
        w1=w1p.astype(compute_dtype), b1=b1.reshape(1, H1),
        w2=w2.astype(compute_dtype),  b2=b2.reshape(1, H2),
        w3=w3.astype(compute_dtype),  b3=b3.reshape(1, H3),
        wo=wop.astype(compute_dtype), bo=bop,
    )


# ----------------------------- wrapper ---------------------------------------
@jax.jit
def feature_model_forward(x, prep):
    """x: (B, IN_DIM) f32. prep: output of prepare_params(). Returns bf16
    logits (B, N_CLASS)."""
    B = x.shape[0]
    # Tile heuristic: always >= 2 (even) grid steps so both v7x TensorCores
    # get work; tiles capped at MAX_TILE rows; Bp derived from B so batch
    # padding waste never exceeds one 8-row group per step.
    n_steps = max(2, 2 * _cdiv(B, 2 * MAX_TILE))
    batch_tile = _pad_to(_cdiv(B, n_steps), 8)
    Bp = batch_tile * n_steps

    cdt = prep["w1"].dtype
    xp = jnp.zeros((Bp, DP), cdt).at[:B, :IN_DIM].set(x.astype(cdt))
    out = _build_call(Bp, batch_tile)(
        xp, prep["w1"], prep["b1"], prep["w2"], prep["b2"],
        prep["w3"], prep["b3"], prep["wo"], prep["bo"])
    return out[:B, :N_CLASS]


# ----------------------------- pure-JAX reference ----------------------------
def reference_forward(x, params):
    g0, be0, mu0, var0 = params["bn0"]
    xs = x * 2.0 - 1.0
    xs = (xs - mu0) / jnp.sqrt(var0 + EPS) * g0 + be0

    def block(h, W, b, bnp):
        g, be, mu, var = bnp
        y = h @ W.T + b
        y = (y - mu) / jnp.sqrt(var + EPS) * g + be
        return jnp.maximum(y, 0.0)

    h = block(xs, params["W1"], params["b1"], params["bn1"])
    h = block(h, params["W2"], params["b2"], params["bn2"])
    h = block(h, params["W3"], params["b3"], params["bn3"])
    return h @ params["Wo"].T + params["bo"]


if __name__ == "__main__":
    key = jax.random.PRNGKey(0)
    kx, kp = jax.random.split(key)
    B = 16
    x = jax.random.uniform(kx, (B, IN_DIM), jnp.float32)  # feature vectors
    params = init_params(kp)

    prep = prepare_params(params)              # one-time fold/pad/cast
    out = feature_model_forward(x, prep)       # jitted kernel call
    out = jax.block_until_ready(out)

    ref = reference_forward(x, params)
    # bf16 matmul operands + bf16 logits vs. f32 reference -> loose tolerance.
    np.testing.assert_allclose(np.asarray(out.astype(jnp.float32)),
                               np.asarray(ref), rtol=5e-2, atol=5e-2)

    assert out.shape == (B, N_CLASS)
    print("KERNEL_OK")
</pallas_src>

<mosaic_0001>
module attributes {stable_mosaic.version = 11 : i64} {
  func.func @mlp_kernel(%arg0: i32, %arg1: memref<8x128xbf16, #tpu.memory_space<vmem>>, %arg2: memref<128x256xbf16, #tpu.memory_space<vmem>>, %arg3: memref<1x256xf32, #tpu.memory_space<vmem>>, %arg4: memref<256x256xbf16, #tpu.memory_space<vmem>>, %arg5: memref<1x256xf32, #tpu.memory_space<vmem>>, %arg6: memref<256x128xbf16, #tpu.memory_space<vmem>>, %arg7: memref<1x128xf32, #tpu.memory_space<vmem>>, %arg8: memref<128x256xbf16, #tpu.memory_space<vmem>>, %arg9: memref<1x256xf32, #tpu.memory_space<vmem>>, %arg10: memref<8x256xbf16, #tpu.memory_space<vmem>>) attributes {dimension_semantics = [#tpu.dimension_semantics<parallel>], iteration_bounds = array<i64: 2>, scalar_prefetch = 0 : i64, scratch_operands = 0 : i64, tpu.core_type = #tpu.core_type<tc>, window_params = [{transform_indices = @transform_0, window_bounds = array<i64: 8, 128>}, {pipeline_mode = #tpu.pipeline_mode<synchronous>, transform_indices = @transform_1, window_bounds = array<i64: 128, 256>}, {pipeline_mode = #tpu.pipeline_mode<synchronous>, transform_indices = @transform_2, window_bounds = array<i64: 1, 256>}, {pipeline_mode = #tpu.pipeline_mode<synchronous>, transform_indices = @transform_3, window_bounds = array<i64: 256, 256>}, {pipeline_mode = #tpu.pipeline_mode<synchronous>, transform_indices = @transform_4, window_bounds = array<i64: 1, 256>}, {pipeline_mode = #tpu.pipeline_mode<synchronous>, transform_indices = @transform_5, window_bounds = array<i64: 256, 128>}, {pipeline_mode = #tpu.pipeline_mode<synchronous>, transform_indices = @transform_6, window_bounds = array<i64: 1, 128>}, {pipeline_mode = #tpu.pipeline_mode<synchronous>, transform_indices = @transform_7, window_bounds = array<i64: 128, 256>}, {pipeline_mode = #tpu.pipeline_mode<synchronous>, transform_indices = @transform_8, window_bounds = array<i64: 1, 256>}, {transform_indices = @transform_9, window_bounds = array<i64: 8, 256>}]} {
    %c0 = arith.constant 0 : index
    %c0_0 = arith.constant 0 : index
    %0 = vector.load %arg1[%c0, %c0_0] : memref<8x128xbf16, #tpu.memory_space<vmem>>, vector<8x128xbf16>
    %c0_1 = arith.constant 0 : index
    %c0_2 = arith.constant 0 : index
    %1 = vector.load %arg2[%c0_1, %c0_2] : memref<128x256xbf16, #tpu.memory_space<vmem>>, vector<128x256xbf16>
    %cst = arith.constant dense<0.000000e+00> : vector<8x256xf32>
    %2 = tpu.matmul %0, %1, %cst {dimension_numbers = #tpu.dot_dimension_numbers<[1], [0], [0], [1], [0, 0, 1, 1], [], []>} : vector<8x128xbf16>, vector<128x256xbf16>, vector<8x256xf32> -> vector<8x256xf32>
    %c0_3 = arith.constant 0 : index
    %c0_4 = arith.constant 0 : index
    %3 = vector.load %arg3[%c0_3, %c0_4] : memref<1x256xf32, #tpu.memory_space<vmem>>, vector<1x256xf32>
    %4 = vector.broadcast %3 : vector<1x256xf32> to vector<8x256xf32>
    %5 = arith.addf %2, %4 : vector<8x256xf32>
    %cst_5 = arith.constant 0.000000e+00 : f32
    %6 = vector.broadcast %cst_5 : f32 to vector<8x256xf32>
    %7 = arith.maximumf %5, %6 : vector<8x256xf32>
    %8 = arith.truncf %7 : vector<8x256xf32> to vector<8x256xbf16>
    %c0_6 = arith.constant 0 : index
    %c0_7 = arith.constant 0 : index
    %9 = vector.load %arg4[%c0_6, %c0_7] : memref<256x256xbf16, #tpu.memory_space<vmem>>, vector<256x256xbf16>
    %cst_8 = arith.constant dense<0.000000e+00> : vector<8x256xf32>
    %10 = tpu.matmul %8, %9, %cst_8 {dimension_numbers = #tpu.dot_dimension_numbers<[1], [0], [0], [1], [0, 0, 1, 1], [], []>} : vector<8x256xbf16>, vector<256x256xbf16>, vector<8x256xf32> -> vector<8x256xf32>
    %c0_9 = arith.constant 0 : index
    %c0_10 = arith.constant 0 : index
    %11 = vector.load %arg5[%c0_9, %c0_10] : memref<1x256xf32, #tpu.memory_space<vmem>>, vector<1x256xf32>
    %12 = vector.broadcast %11 : vector<1x256xf32> to vector<8x256xf32>
    %13 = arith.addf %10, %12 : vector<8x256xf32>
    %cst_11 = arith.constant 0.000000e+00 : f32
    %14 = vector.broadcast %cst_11 : f32 to vector<8x256xf32>
    %15 = arith.maximumf %13, %14 : vector<8x256xf32>
    %16 = arith.truncf %15 : vector<8x256xf32> to vector<8x256xbf16>
    %c0_12 = arith.constant 0 : index
    %c0_13 = arith.constant 0 : index
    %17 = vector.load %arg6[%c0_12, %c0_13] : memref<256x128xbf16, #tpu.memory_space<vmem>>, vector<256x128xbf16>
    %cst_14 = arith.constant dense<0.000000e+00> : vector<8x128xf32>
    %18 = tpu.matmul %16, %17, %cst_14 {dimension_numbers = #tpu.dot_dimension_numbers<[1], [0], [0], [1], [0, 0, 1, 1], [], []>} : vector<8x256xbf16>, vector<256x128xbf16>, vector<8x128xf32> -> vector<8x128xf32>
    %c0_15 = arith.constant 0 : index
    %c0_16 = arith.constant 0 : index
    %19 = vector.load %arg7[%c0_15, %c0_16] : memref<1x128xf32, #tpu.memory_space<vmem>>, vector<1x128xf32>
    %20 = vector.broadcast %19 : vector<1x128xf32> to vector<8x128xf32>
    %21 = arith.addf %18, %20 : vector<8x128xf32>
    %cst_17 = arith.constant 0.000000e+00 : f32
    %22 = vector.broadcast %cst_17 : f32 to vector<8x128xf32>
    %23 = arith.maximumf %21, %22 : vector<8x128xf32>
    %24 = arith.truncf %23 : vector<8x128xf32> to vector<8x128xbf16>
    %c0_18 = arith.constant 0 : index
    %c0_19 = arith.constant 0 : index
    %25 = vector.load %arg8[%c0_18, %c0_19] : memref<128x256xbf16, #tpu.memory_space<vmem>>, vector<128x256xbf16>
    %cst_20 = arith.constant dense<0.000000e+00> : vector<8x256xf32>
    %26 = tpu.matmul %24, %25, %cst_20 {dimension_numbers = #tpu.dot_dimension_numbers<[1], [0], [0], [1], [0, 0, 1, 1], [], []>} : vector<8x128xbf16>, vector<128x256xbf16>, vector<8x256xf32> -> vector<8x256xf32>
    %c0_21 = arith.constant 0 : index
    %c0_22 = arith.constant 0 : index
    %27 = vector.load %arg9[%c0_21, %c0_22] : memref<1x256xf32, #tpu.memory_space<vmem>>, vector<1x256xf32>
    %28 = vector.broadcast %27 : vector<1x256xf32> to vector<8x256xf32>
    %29 = arith.addf %26, %28 : vector<8x256xf32>
    %30 = arith.truncf %29 : vector<8x256xf32> to vector<8x256xbf16>
    %c0_23 = arith.constant 0 : index
    %c0_24 = arith.constant 0 : index
    %31 = vector.load %arg10[%c0_23, %c0_24] : memref<8x256xbf16, #tpu.memory_space<vmem>>, vector<8x256xbf16>
    tpu.vector_store %arg10[%c0_23, %c0_24], %30 {strides = array<i32>} : memref<8x256xbf16, #tpu.memory_space<vmem>>, vector<8x256xbf16>,
    return
  }
  func.func @transform_0(%arg0: i32) -> (i32, i32) {
    %c0_i32 = arith.constant 0 : i32
    %c0_i32_0 = arith.constant 0 : i32
    return %arg0, %c0_i32 : i32, i32
  }
  func.func @transform_1(%arg0: i32) -> (i32, i32) {
    %c0_i32 = arith.constant 0 : i32
    %c0_i32_0 = arith.constant 0 : i32
    %c0_i32_1 = arith.constant 0 : i32
    return %c0_i32, %c0_i32_0 : i32, i32
  }
  func.func @transform_2(%arg0: i32) -> (i32, i32) {
    %c0_i32 = arith.constant 0 : i32
    %c0_i32_0 = arith.constant 0 : i32
    %c0_i32_1 = arith.constant 0 : i32
    return %c0_i32, %c0_i32_0 : i32, i32
  }
  func.func @transform_3(%arg0: i32) -> (i32, i32) {
    %c0_i32 = arith.constant 0 : i32
    %c0_i32_0 = arith.constant 0 : i32
    %c0_i32_1 = arith.constant 0 : i32
    return %c0_i32, %c0_i32_0 : i32, i32
  }
  func.func @transform_4(%arg0: i32) -> (i32, i32) {
    %c0_i32 = arith.constant 0 : i32
    %c0_i32_0 = arith.constant 0 : i32
    %c0_i32_1 = arith.constant 0 : i32
    return %c0_i32, %c0_i32_0 : i32, i32
  }
  func.func @transform_5(%arg0: i32) -> (i32, i32) {
    %c0_i32 = arith.constant 0 : i32
    %c0_i32_0 = arith.constant 0 : i32
    %c0_i32_1 = arith.constant 0 : i32
    return %c0_i32, %c0_i32_0 : i32, i32
  }
  func.func @transform_6(%arg0: i32) -> (i32, i32) {
    %c0_i32 = arith.constant 0 : i32
    %c0_i32_0 = arith.constant 0 : i32
    %c0_i32_1 = arith.constant 0 : i32
    return %c0_i32, %c0_i32_0 : i32, i32
  }
  func.func @transform_7(%arg0: i32) -> (i32, i32) {
    %c0_i32 = arith.constant 0 : i32
    %c0_i32_0 = arith.constant 0 : i32
    %c0_i32_1 = arith.constant 0 : i32
    return %c0_i32, %c0_i32_0 : i32, i32
  }
  func.func @transform_8(%arg0: i32) -> (i32, i32) {
    %c0_i32 = arith.constant 0 : i32
    %c0_i32_0 = arith.constant 0 : i32
    %c0_i32_1 = arith.constant 0 : i32
    return %c0_i32, %c0_i32_0 : i32, i32
  }
  func.func @transform_9(%arg0: i32) -> (i32, i32) {
    %c0_i32 = arith.constant 0 : i32
    %c0_i32_0 = arith.constant 0 : i32
    return %arg0, %c0_i32 : i32, i32
  }
}

</mosaic_0001>

<bundles_post_ra>
// kernel: feature_model_forward.1
= control target key start
LH: loop header
LB: loop body
LE: loop exit
PB: predicated region body
PF: predicated region fallthrough
CT: control target
= control target key end

     0   :  { %14 = vsyncpa [#allocation3], 0  ;;  %s2066_s0 = inlined_call_operand.vmem [shape: bf16[16,128], index: 0, kind: input, shape index: {}]   ;;  %s2067_s1 = inlined_call_operand.hbm [shape: bf16[128,256], index: 1, kind: input, shape index: {}]   ;;  %s2068_s2 = inlined_call_operand.vmem [shape: f32[1,256], index: 2, kind: input, shape index: {}]   ;;  %s2069_s3 = inlined_call_operand.hbm [shape: bf16[256,256], index: 3, kind: input, shape index: {}]   ;;  %s2070_s4 = inlined_call_operand.vmem [shape: f32[1,256], index: 4, kind: input, shape index: {}]   ;;  %s2071_s5 = inlined_call_operand.hbm [shape: bf16[256,128], index: 5, kind: input, shape index: {}]   ;;  %s2072_s6 = inlined_call_operand.vmem [shape: f32[1,128], index: 6, kind: input, shape index: {}]   ;;  %s2073_s7 = inlined_call_operand.hbm [shape: bf16[128,256], index: 7, kind: input, shape index: {}]   ;;  %s2074_s8 = inlined_call_operand.vmem [shape: f32[1,256], index: 8, kind: input, shape index: {}]   ;;  %s2075_s9 = inlined_call_operand.hbm [shape: bf16[16,256], index: 9, kind: output, shape index: {}]  }
   0x1   :  { %15 = vsyncpa [#allocation6], 0 }
   0x2   :  { %16 = vsyncpa [#allocation9], 0 }
   0x3   :  { %17 = vsyncpa [#allocation4], 0 }
   0x4   :  { %19 = vsyncpa [#allocation4 + $0x1], 0  ;;  %s1811_s30 = smov 0   ;;  %s1813_s10 = smov 0  }
   0x5   :  { %s1815_s11 = smov 0   ;;  %s1817_s12 = smov 0  }
   0x6 LB: > { %2086 = sst [smem:[#allocation15_spill]] %s1737_s30  ;;  %s1832_s13 = sadd.s32 4294967295, %s1749_s12   ;;  %s1749_s12 = sphi %s1817_s12, %s2109_s12   ;;  %s1745_s11 = sphi %s1815_s11, %s2111_s11   ;;  %s1741_s10 = sphi %s1813_s10, %s2113_s10   ;;  %s1737_s30 = sphi %s1811_s30, %s2112_s30  }
   0x7   : > { %2087 = sst [smem:[#allocation16_spill]] %s1745_s11  ;;  %s1241_s14 = sadd.s32 4294967294, %s1749_s12  }
   0x8   : > { %s1836_s15 = sadd.s32 1, %s1749_s12   ;;  %s226_s16 = sadd.s32 1, %s1745_s11 }
   0x9   : > { %2088 = sst [smem:[#allocation17_spill]] %s1836_s15  ;;  %s223_s17 = ssub.s32 %s1749_s12, %s1836_s15 }
   0xa   : > { %p236_p0 = scmp.ne.s32.totalorder %s1745_s11, %s1741_s10  ;;  %p224_p1 = scmp.eq.s32.totalorder %s223_s17, 0 }
   0xb   : > { %p237_p2 = scmp.eq.s32.totalorder %s1832_s13, 1  ;;  %p242_p3 = scmp.ne.s32.totalorder %s1741_s10, %s1737_s30 }
   0xc   : > { %p243_p4 = scmp.eq.s32.totalorder %s1241_s14, 1  ;;  %p1242_p7 = scmp.ge.s32.totalorder %s1749_s12, 1 }
   0xd   : > { %s1847_s18 = scalar_select %p224_p1, %s1745_s11, %s226_s16  }
   0xe   : > { %p1849_p5 = por %p237_p2, %p236_p0  ;;  %p1853_p6 = por %p243_p4, %p242_p3 }
   0xf   : > { %2089 = sst [smem:[#allocation18_spill]] %s1847_s18  ;;  %p250_p8 = scmp.lt.s32.totalorder %s1749_s12, 3 }
  0x10   : > { %s2090_s19 = scalar_select %p1849_p5, 1, 0 }
  0x11   : > { %s2091_s20 = scalar_select %p1853_p6, 1, 0 }
  0x12   : > { %p2076_p9 = scmp.eq.s32.totalorder %s1832_s13, 0  ;;  %p1860_p10 = pnand %p1242_p7, %p250_p8 }
  0x13   : > { %2092 = sst [smem:[#allocation19_spill]] %s2091_s20  ;;  %s1751_s22 = smov [#allocation5]  }
  0x14   : > { %s2093_s21 = scalar_select %p1860_p10, 1, 0 }
  0x15   : > { %p1384_p11 = pneg %p1860_p10  ;;  %s278_s23 = sshll.u32 %s1751_s22, 4  ;;  %s1866_s23 = int_to_ptr.vmem [resolvable:$true] %s278_s23 }
  0x16   : > { %s1752_s25 = smov [#allocation2]   ;;  %s1753_s27 = smov [#allocation7]  }
  0x17   : > { %p1870_p12 = pnand %p2076_p9, %p1384_p11  ;;  %s262_s26 = sshll.u32 %s1752_s25, 4  ;;  %s1874_s26 = int_to_ptr.vmem [resolvable:$true] %s262_s26 }
  0x18   : > { %s1876_s28 = sshll.u32 %s1753_s27, 4  ;;  %s1563_s16 = scalar_lea.hbm %s2069_s3, 4096  ;;  %s295_s28 = int_to_ptr.vmem [resolvable:$true] %s1876_s28 }
  0x19   : > { %p1564_p13 = scmp.ne.s32.totalorder %s2069_s3, %s1563_s16  ;;  %p1886_p0 = pneg %p1870_p12 }
  0x1a   : > { %p1570_p3 = scmp.lt.u32.totalorder %s1563_s16, %s2069_s3 }
  0x1b   : > { %p1566_p1 = pnand %p1886_p0, %p1564_p13 }
  0x1d   : > { %p1567_p2 = pneg %p1566_p1 }
  0x1f   : > { %p1572_p4 = pnand %p1570_p3, %p1567_p2 }
  0x21   : > { %1575 = shalt.err (!%p1572_p4)
}
  0x22   : > { %s1576_s29 = scalar_lea.vmem %s1866_s23, 4096  ;;  %p1584_p9 = scmp.lt.s32.totalorder %s1866_s23, %s1866_s23 }
  0x23   : > { %p1577_p7 = scmp.ne.s32.totalorder %s1866_s23, %s1576_s29  ;;  %p1585_p6 = scmp.lt.s32.totalorder %s1576_s29, %s1576_s29 }
  0x25   : > { %p1579_p8 = pnand %p1577_p7, %p1886_p0  ;;  %p1586_p13 = por %p1585_p6, %p1584_p9 }
  0x27   : > { %p1580_p11 = pneg %p1579_p8 }
  0x29   : > { %p1587_p1 = pnand %p1586_p13, %p1580_p11 }
  0x2b   : > { %1590 = shalt.err (!%p1587_p1)
}
  0x2c   : > { %s2084_s14 = smov 128   ;;  %s2085_s16 = smov 8  }
  0x2d   : > { %1390 = dma.hbm_to_vmem [thread:$0]  (!%p1870_p12), %s2069_s3, 4096, %s1866_s23, [#allocation6], %s2084_s14, %s2084_s14, %s2085_s16  }
  0x2e   : > { %s1591_s29 = scalar_lea.hbm %s2067_s1, 2048 }
  0x2f   : > { %p1592_p6 = scmp.ne.s32.totalorder %s2067_s1, %s1591_s29  ;;  %p1598_p3 = scmp.lt.u32.totalorder %s1591_s29, %s2067_s1 }
  0x31   : > { %p1594_p9 = pnand %p1592_p6, %p1886_p0 }
  0x33   : > { %p1595_p2 = pneg %p1594_p9 }
  0x35   : > { %p1600_p4 = pnand %p1598_p3, %p1595_p2 }
  0x37   : > { %1603 = shalt.err (!%p1600_p4)
}
  0x38   : > { %s1604_s23 = scalar_lea.vmem %s1874_s26, 2048  ;;  %p1612_p13 = scmp.lt.s32.totalorder %s1874_s26, %s1874_s26 }
  0x39   : > { %p1605_p7 = scmp.ne.s32.totalorder %s1874_s26, %s1604_s23  ;;  %p1613_p1 = scmp.lt.s32.totalorder %s1604_s23, %s1604_s23 }
  0x3b   : > { %p1607_p8 = pnand %p1605_p7, %p1886_p0  ;;  %p1614_p6 = por %p1613_p1, %p1612_p13 }
  0x3d   : > { %p1608_p11 = pneg %p1607_p8 }
  0x3f   : > { %p1615_p9 = pnand %p1614_p6, %p1608_p11 }
  0x41   : > { %1618 = shalt.err (!%p1615_p9)
}
  0x42   : > { %1387 = dma.hbm_to_vmem [thread:$0]  (!%p1870_p12), %s2067_s1, 2048, %s1874_s26, [#allocation3], %s2084_s14, %s2084_s14, %s2085_s16  }
  0x43   : > { %s1619_s17 = scalar_lea.hbm %s2071_s5, 2048 }
  0x44   : > { %p1620_p2 = scmp.ne.s32.totalorder %s2071_s5, %s1619_s17  ;;  %p1626_p7 = scmp.lt.u32.totalorder %s1619_s17, %s2071_s5 }
  0x46   : > { %p1622_p3 = pnand %p1620_p2, %p1886_p0 }
  0x48   : > { %p1623_p4 = pneg %p1622_p3 }
  0x4a   : > { %p1628_p8 = pnand %p1626_p7, %p1623_p4 }
  0x4c   : > { %1631 = shalt.err (!%p1628_p8)
}
  0x4d   : > { %s1632_s23 = scalar_lea.vmem %s295_s28, 2048  ;;  %p1640_p6 = scmp.lt.s32.totalorder %s295_s28, %s295_s28 }
  0x4e   : > { %p1633_p11 = scmp.ne.s32.totalorder %s295_s28, %s1632_s23  ;;  %p1641_p9 = scmp.lt.s32.totalorder %s1632_s23, %s1632_s23 }
  0x50   : > { %p1635_p13 = pnand %p1633_p11, %p1886_p0  ;;  %p1642_p5 = por %p1641_p9, %p1640_p6 }
  0x52   : > { %p1636_p1 = pneg %p1635_p13 }
  0x54   : > { %p1643_p10 = pnand %p1642_p5, %p1636_p1 }
  0x56   : > { %1646 = shalt.err (!%p1643_p10)
}
  0x57   : > { %s1756_s26 = smov 64   ;;  %s1757_s30 = smov 4  }
  0x58   : > { %1393 = dma.hbm_to_vmem [thread:$0]  (!%p1870_p12), %s2071_s5, 2048, %s295_s28, [#allocation6], %s1756_s26, %s1756_s26, %s1757_s30  }
  0x59   : > { %s1758_s20 = smov [#allocation8]   ;;  %s1647_s27 = scalar_lea.hbm %s2073_s7, 2048 }
  0x5a   : > { %s310_s17 = sshll.u32 %s1758_s20, 4  ;;  %p1648_p5 = scmp.ne.s32.totalorder %s2073_s7, %s1647_s27  ;;  %s311_s17 = int_to_ptr.vmem [resolvable:$true] %s310_s17 }
  0x5b   : > { %p1654_p3 = scmp.lt.u32.totalorder %s1647_s27, %s2073_s7 }
  0x5c   : > { %p1650_p10 = pnand %p1648_p5, %p1886_p0 }
  0x5e   : > { %p1651_p2 = pneg %p1650_p10 }
  0x60   : > { %p1656_p4 = pnand %p1654_p3, %p1651_p2 }
  0x62   : > { %1659 = shalt.err (!%p1656_p4)
}
  0x63   : > { %s1660_s28 = scalar_lea.vmem %s311_s17, 2048  ;;  %p1668_p13 = scmp.lt.s32.totalorder %s311_s17, %s311_s17 }
  0x64   : > { %p1661_p7 = scmp.ne.s32.totalorder %s311_s17, %s1660_s28  ;;  %p1669_p1 = scmp.lt.s32.totalorder %s1660_s28, %s1660_s28 }
  0x66   : > { %p1663_p8 = pnand %p1661_p7, %p1886_p0  ;;  %p1670_p6 = por %p1669_p1, %p1668_p13 }
  0x68   : > { %p1664_p11 = pneg %p1663_p8 }
  0x6a   : > { %p1671_p9 = pnand %p1670_p6, %p1664_p11 }
  0x6c   : > { %1674 = shalt.err (!%p1671_p9)
}
  0x6d   : > { %s2096_s26 = smov 8   ;;  %s2097_s30 = smov 128  }
  0x6e   : > { %1396 = dma.hbm_to_vmem [thread:$0]  (!%p1870_p12), %s2073_s7, 2048, %s311_s17, [#allocation9], %s2097_s30, %s2097_s30, %s2096_s26  }
  0x6f   : > { %p2098_p5 = scmp.ne.s32.totalorder %s2093_s21, 0 }
  0x70   : > { %p2099_p0 = scmp.eq.s32.totalorder (!%p2098_p5), %s1832_s13, 0 }
  0x71   : > { %336 = sbr.rel (%p2098_p5) target bundleno = 1052 (0x41c), region = 56 }
  0x78   : > { %1720 = dma.done.wait (%p2099_p0), [#allocation3], 2048   ;;  %p2100_p10 = pmov %p2099_p0 }
  0x79   : > { %p2101_p2 = pmov %p2099_p0 }
  0x7a   : > { %1722 = vsyncadd (%p2100_p10), [#allocation3], 4294965248 }
  0x7b   : > { %1724 = dma.done.wait (%p2101_p2), [#allocation6], 6144   ;;  %p2102_p3 = pmov %p2099_p0 }
  0x7c   : > { %p2103_p4 = pmov %p2099_p0 }
  0x7d   : > { %1726 = vsyncadd (%p2102_p3), [#allocation6], 4294961152 }
  0x7e   : > { %1728 = dma.done.wait (%p2103_p4), [#allocation9], 2048   ;;  %p2104_p12 = pmov %p2099_p0 }
  0x7f   : > { %v1759_v0 = vmov 0   ;;  %v1451_v1 = vld [vmem:[#allocation2 + $0x4] ss:$8 sps:$4 sm:$0xff]   ;;  %v1453_v2 = vld [vmem:[#allocation2] ss:$8 sps:$4 sm:$0xff]   ;;  %p383_p7 = scmp.lt.s32.totalorder %s1832_s13, 1  ;;  %v407_v62 = vlaneseq }
  0x80   : > { %1730 = vsyncadd (%p2104_p12), [#allocation9], 4294965248  ;;  %529 = vmatprep.mubr.bf16.mxu0 %v1759_v0  ;;  %497 = vmatprep.subr.bf16.mxu0 %v1451_v1  ;;  %v1454_v3 = vld [vmem:[#allocation2 + $0x14] ss:$8 sps:$4 sm:$0xff]   ;;  %v1456_v4 = vld [vmem:[#allocation2 + $0x10] ss:$8 sps:$4 sm:$0xff]  }
  0x81   : > { %498 = vmatpush1.bf16.msra.mxu0 %v1453_v2  ;;  %v1457_v5 = vld [vmem:[#allocation2 + $0x24] ss:$8 sps:$4 sm:$0xff]   ;;  %v1459_v6 = vld [vmem:[#allocation2 + $0x20] ss:$8 sps:$4 sm:$0xff]   ;;  %v1460_v7 = vld [vmem:[#allocation2 + $0x34] ss:$8 sps:$4 sm:$0xff]  }
  0x82   : > { %499 = vmatprep.subr.bf16.mxu0 %v1454_v3  ;;  %v1462_v8 = vld [vmem:[#allocation2 + $0x30] ss:$8 sps:$4 sm:$0xff]   ;;  %v1463_v9 = vld [vmem:[#allocation2 + $0x44] ss:$8 sps:$4 sm:$0xff]   ;;  %v1477_v11 = vld [vmem:[#allocation5] ss:$8 sps:$4 sm:$0xff]  }
  0x83   : > { %v1475_v10 = vld [vmem:[#allocation5 + $0x4] ss:$8 sps:$4 sm:$0xff]   ;;  %v1478_v12 = vld [vmem:[#allocation5 + $0x14] ss:$8 sps:$4 sm:$0xff]   ;;  %v1465_v13 = vld [vmem:[#allocation2 + $0x40] ss:$8 sps:$4 sm:$0xff]  }
  0x84   : > { %746 = vmatprep.subr.bf16.mxu1 %v1475_v10  ;;  %v1480_v14 = vld [vmem:[#allocation5 + $0x10] ss:$8 sps:$4 sm:$0xff]   ;;  %v1481_v15 = vld [vmem:[#allocation5 + $0x24] ss:$8 sps:$4 sm:$0xff]   ;;  %v1466_v16 = vld [vmem:[#allocation2 + $0x54] ss:$8 sps:$4 sm:$0xff]  }
  0x85   : > { %500 = vmatpush1.bf16.msra.mxu0 %v1456_v4  ;;  %747 = vmatpush1.bf16.msra.mxu1 %v1477_v11  ;;  %v1468_v17 = vld [vmem:[#allocation2 + $0x50] ss:$8 sps:$4 sm:$0xff]   ;;  %v1483_v18 = vld [vmem:[#allocation5 + $0x20] ss:$8 sps:$4 sm:$0xff]   ;;  %s384_s18 = scalar_select %p383_p7, %s1832_s13, 1  ;;  %v408_v63 = vshrl.u32 %v407_v62, 7 }
  0x86   : > { %501 = vmatprep.subr.bf16.mxu0 %v1457_v5  ;;  %748 = vmatprep.subr.bf16.mxu1 %v1478_v12  ;;  %v1484_v19 = vld [vmem:[#allocation5 + $0x34] ss:$8 sps:$4 sm:$0xff]   ;;  %v1469_v20 = vld [vmem:[#allocation2 + $0x64] ss:$8 sps:$4 sm:$0xff]   ;;  %v1471_v21 = vld [vmem:[#allocation2 + $0x60] ss:$8 sps:$4 sm:$0xff]  }
  0x87   : > { %v1486_v22 = vld [vmem:[#allocation5 + $0x30] ss:$8 sps:$4 sm:$0xff]   ;;  %s1254_s21 = sshll.u32 %s384_s18, 2  ;;  %v1487_v23 = vld [vmem:[#allocation5 + $0x44] ss:$8 sps:$4 sm:$0xff]   ;;  %v1996_v1 = vsub.s32 0, %v408_v63 }
  0x88   : > { %v1472_v24 = vld [vmem:[#allocation2 + $0x74] ss:$8 sps:$4 sm:$0xff]   ;;  %v1474_v25 = vld [vmem:[#allocation2 + $0x70] ss:$8 sps:$4 sm:$0xff]   ;;  %s386_s15 = scalar_lea.vmem %s2066_s0, %s1254_s21  ;;  %v1489_v26 = vld [vmem:[#allocation5 + $0x40] ss:$8 sps:$4 sm:$0xff]  }
  0x89   : > { %502 = vmatpush1.bf16.msra.mxu0 %v1459_v6  ;;  %749 = vmatpush1.bf16.msra.mxu1 %v1480_v14  ;;  %v1490_v27 = vld [vmem:[#allocation5 + $0x54] ss:$8 sps:$4 sm:$0xff]   ;;  %v388_v28 = vld [vmem:[%s386_s15] sm:$0xf]  ;;  %v1492_v29 = vld [vmem:[#allocation5 + $0x50] ss:$8 sps:$4 sm:$0xff]  }
  0x8a   : > { %503 = vmatprep.subr.bf16.mxu0 %v1460_v7  ;;  %750 = vmatprep.subr.bf16.mxu1 %v1481_v15  ;;  %v1493_v30 = vld [vmem:[#allocation5 + $0x64] ss:$8 sps:$4 sm:$0xff]   ;;  %v1495_v31 = vld [vmem:[#allocation5 + $0x60] ss:$8 sps:$4 sm:$0xff]   ;;  %v1496_v32 = vld [vmem:[#allocation5 + $0x74] ss:$8 sps:$4 sm:$0xff]  }
  0x8b   : > { %v1498_v33 = vld [vmem:[#allocation5 + $0x70] ss:$8 sps:$4 sm:$0xff]   ;;  %v1499_v34 = vld [vmem:[#allocation5 + $0x84] ss:$8 sps:$4 sm:$0xff]   ;;  %v1501_v35 = vld [vmem:[#allocation5 + $0x80] ss:$8 sps:$4 sm:$0xff]  }
  0x8c   : > { %v1502_v36 = vld [vmem:[#allocation5 + $0x94] ss:$8 sps:$4 sm:$0xff]   ;;  %v1504_v37 = vld [vmem:[#allocation5 + $0x90] ss:$8 sps:$4 sm:$0xff]   ;;  %v1505_v38 = vld [vmem:[#allocation5 + $0xa4] ss:$8 sps:$4 sm:$0xff]  }
  0x8d   : > { %504 = vmatpush1.bf16.msra.mxu0 %v1462_v8  ;;  %751 = vmatpush1.bf16.msra.mxu1 %v1483_v18  ;;  %v1507_v39 = vld [vmem:[#allocation5 + $0xa0] ss:$8 sps:$4 sm:$0xff]   ;;  %v1508_v40 = vld [vmem:[#allocation5 + $0xb4] ss:$8 sps:$4 sm:$0xff]   ;;  %v1510_v41 = vld [vmem:[#allocation5 + $0xb0] ss:$8 sps:$4 sm:$0xff]  }
  0x8e   : > { %505 = vmatprep.subr.bf16.mxu0 %v1463_v9  ;;  %752 = vmatprep.subr.bf16.mxu1 %v1484_v19  ;;  %v1511_v42 = vld [vmem:[#allocation5 + $0xc4] ss:$8 sps:$4 sm:$0xff]   ;;  %v1513_v43 = vld [vmem:[#allocation5 + $0xc0] ss:$8 sps:$4 sm:$0xff]   ;;  %v1514_v44 = vld [vmem:[#allocation5 + $0xd4] ss:$8 sps:$4 sm:$0xff]  }
  0x8f   : > { %v1516_v45 = vld [vmem:[#allocation5 + $0xd0] ss:$8 sps:$4 sm:$0xff]   ;;  %v1517_v46 = vld [vmem:[#allocation5 + $0xe4] ss:$8 sps:$4 sm:$0xff]   ;;  %v1519_v47 = vld [vmem:[#allocation5 + $0xe0] ss:$8 sps:$4 sm:$0xff]  }
  0x90   : > { %v1520_v48 = vld [vmem:[#allocation5 + $0xf4] ss:$8 sps:$4 sm:$0xff]   ;;  %v1522_v49 = vld [vmem:[#allocation5 + $0xf0] ss:$8 sps:$4 sm:$0xff]   ;;  %v1523_v50 = vld [vmem:[#allocation7 + $0x40] sm:$0xff]   ;;  %v2001_v3 = vsub.s32 1, %v408_v63 }
  0x91   : > { %506 = vmatpush1.bf16.msra.mxu0 %v1465_v13  ;;  %753 = vmatpush1.bf16.msra.mxu1 %v1486_v22  ;;  %v1524_v51 = vld [vmem:[#allocation7] sm:$0xff]   ;;  %v1525_v52 = vld [vmem:[#allocation7 + $0x48] sm:$0xff]   ;;  %v1527_v54 = vld [vmem:[#allocation7 + $0x50] sm:$0xff]   ;;  %s380_s23 = sand.u32 1, %s1741_s10   ;;  %s1343_s14 = sshll.u32 %s1832_s13, 7 }
  0x92   : > { %507 = vmatprep.subr.bf16.mxu0 %v1466_v16  ;;  %754 = vmatprep.subr.bf16.mxu1 %v1487_v23  ;;  %v1526_v53 = vld [vmem:[#allocation7 + $0x8] sm:$0xff]   ;;  %v1528_v55 = vld [vmem:[#allocation7 + $0x10] sm:$0xff]   ;;  %v1529_v56 = vld [vmem:[#allocation7 + $0x58] sm:$0xff]   ;;  %s1253_s30 = sshll.u32 %s380_s23, 3  ;;  %s2024_s11 = scalar_lea.hbm %s2075_s9, %s1343_s14 }
  0x93   : > { %v1530_v57 = vld [vmem:[#allocation7 + $0x18] sm:$0xff]   ;;  %v1531_v58 = vld [vmem:[#allocation7 + $0x60] sm:$0xff]   ;;  %v1533_v60 = vld [vmem:[#allocation7 + $0x68] sm:$0xff]   ;;  %s382_s16 = scalar_lea.vmem [#allocation10], %s1253_s30  ;;  %s1127_s15 = scalar_lea.sflag [#allocation4], %s380_s23 }
  0x94   : > { %v1532_v59 = vld [vmem:[#allocation7 + $0x20] sm:$0xff]   ;;  %v1534_v61 = vld [vmem:[#allocation7 + $0x28] sm:$0xff]   ;;  %v1535_v16 = vld [vmem:[#allocation7 + $0x70] sm:$0xff]   ;;  %s1141_s18 = sshll.u32 %s382_s16, 4  ;;  %p2105_p11 = scmp.ne.s32.totalorder %s2090_s19, 0  ;;  %s2026_s18 = int_to_ptr.vmem [resolvable:$true] %s1141_s18 }
  0x95   : > { %508 = vmatpush1.bf16.msra.mxu0 %v1468_v17  ;;  %755 = vmatpush1.bf16.msra.mxu1 %v1489_v26  ;;  %v405_v2 = vld [vmem:[%s2068_s2] sm:$0x3]  ;;  %v1536_v17 = vld [vmem:[#allocation7 + $0x30] sm:$0xff]   ;;  %v1537_v18 = vld [vmem:[#allocation7 + $0x78] sm:$0xff]   ;;  %s1675_s20 = scalar_lea.vmem %s2026_s18, 128  ;;  %s1760_s13 = smov [#allocation10]  }
  0x96   : > { %509 = vmatprep.subr.bf16.mxu0 %v1469_v20  ;;  %756 = vmatprep.subr.bf16.mxu1 %v1490_v27  ;;  %v410_v4 = vrot.slane %v405_v2, %v1996_v1  ;;  %v414_v5 = vrot.slane %v405_v2, %v2001_v3  ;;  %v1538_v19 = vld [vmem:[#allocation7 + $0x38] sm:$0xff]   ;;  %v1541_v20 = vld [vmem:[#allocation8 + $0x4] ss:$8 sps:$4 sm:$0xff]   ;;  %p1676_p8 = scmp.ne.s32.totalorder %s2026_s18, %s1675_s20  ;;  %s1679_s17 = sshll.u32 %s1760_s13, 4  ;;  %s1680_s17 = int_to_ptr.vmem [resolvable:$false] %s1679_s17 }
  0x97   : > { %s1681_s22 = scalar_lea.vmem %s1680_s17, 256  ;;  %p1682_p6 = scmp.lt.s32.totalorder %s2026_s18, %s1680_s17 }
  0x98   : > { %p1677_p13 = pnand %p1676_p8, %p2105_p11  ;;  %p1683_p9 = scmp.lt.s32.totalorder %s1681_s22, %s1675_s20 }
  0x99   : > { %510 = vmatpush1.bf16.msra.mxu0 %v1471_v21  ;;  %757 = vmatpush1.bf16.msra.mxu1 %v1492_v29  ;;  %v574_v21 = vld [vmem:[%s2070_s4] sm:$0x3] }
  0x9a   : > { %511 = vmatprep.subr.bf16.mxu0 %v1472_v24  ;;  %758 = vmatprep.subr.bf16.mxu1 %v1493_v30  ;;  %v579_v22 = vrot.slane %v574_v21, %v1996_v1  ;;  %v583_v23 = vrot.slane %v574_v21, %v2001_v3  ;;  %p1678_p1 = pneg %p1677_p13  ;;  %p1684_p5 = por %p1683_p9, %p1682_p6 }
  0x9c   : > { %p1685_p0 = pnand %p1684_p5, %p1678_p1 }
  0x9d   : > { %512 = vmatpush1.bf16.msra.mxu0 %v1474_v25  ;;  %759 = vmatpush1.bf16.msra.mxu1 %v1495_v31 }
  0x9e   : > { %760 = vmatprep.subr.bf16.mxu1 %v1496_v32  ;;  %1344 = vmatprep.subr.bf16.mxu0 %v1523_v50 }
  0xa0   : > { %530 = vmatmul.mubr.bf16.vlgmr.msra.gmra.mrb[0].mxu0 %v388_v28 }
  0xa1   : > { %761 = vmatpush1.bf16.msra.mxu1 %v1498_v33  ;;  %1345 = vmatpush3.bf16.msra.mxu0 %v1524_v51  ;;  %v1539_v33 = vld [vmem:[#allocation8] ss:$8 sps:$4 sm:$0xff]  }
  0xa2   : > { %762 = vmatprep.subr.bf16.mxu1 %v1499_v34  ;;  %1346 = vmatprep.subr.bf16.mxu0 %v1525_v52 }
  0xa5   : > { %763 = vmatpush1.bf16.msra.mxu1 %v1501_v35  ;;  %1347 = vmatpush3.bf16.msra.mxu0 %v1526_v53  ;;  %v1544_v35 = vld [vmem:[#allocation8 + $0x14] ss:$8 sps:$4 sm:$0xff]  }
  0xa6   : > { %764 = vmatprep.subr.bf16.mxu1 %v1502_v36  ;;  %1348 = vmatprep.subr.bf16.mxu0 %v1527_v54  ;;  %v1542_v36 = vld [vmem:[#allocation8 + $0x10] ss:$8 sps:$4 sm:$0xff]  }
  0xa9   : > { %765 = vmatpush1.bf16.msra.mxu1 %v1504_v37  ;;  %1349 = vmatpush3.bf16.msra.mxu0 %v1528_v55  ;;  %v1547_v37 = vld [vmem:[#allocation8 + $0x24] ss:$8 sps:$4 sm:$0xff]  }
  0xaa   : > { %766 = vmatprep.subr.bf16.mxu1 %v1505_v38  ;;  %1350 = vmatprep.subr.bf16.mxu0 %v1529_v56  ;;  %v1545_v38 = vld [vmem:[#allocation8 + $0x20] ss:$8 sps:$4 sm:$0xff]  }
  0xad   : > { %767 = vmatpush1.bf16.msra.mxu1 %v1507_v39  ;;  %1351 = vmatpush3.bf16.msra.mxu0 %v1530_v57  ;;  %v1550_v39 = vld [vmem:[#allocation8 + $0x34] ss:$8 sps:$4 sm:$0xff]   ;;  %v984_v57 = vld [vmem:[%s2074_s8] sm:$0x3] }
  0xae   : > { %768 = vmatprep.subr.bf16.mxu1 %v1508_v40  ;;  %1352 = vmatprep.subr.bf16.mxu0 %v1531_v58  ;;  %v1548_v40 = vld [vmem:[#allocation8 + $0x30] ss:$8 sps:$4 sm:$0xff]   ;;  %v989_v58 = vrot.slane %v984_v57, %v1996_v1 }
  0xb1   : > { %769 = vmatpush1.bf16.msra.mxu1 %v1510_v41  ;;  %1353 = vmatpush3.bf16.msra.mxu0 %v1532_v59  ;;  %v1553_v41 = vld [vmem:[#allocation8 + $0x44] ss:$8 sps:$4 sm:$0xff]   ;;  %v993_v59 = vrot.slane %v984_v57, %v2001_v3 }
  0xb2   : > { %770 = vmatprep.subr.bf16.mxu1 %v1511_v42  ;;  %1354 = vmatprep.subr.bf16.mxu0 %v1533_v60  ;;  %v1551_v42 = vld [vmem:[#allocation8 + $0x40] ss:$8 sps:$4 sm:$0xff]  }
  0xb5   : > { %771 = vmatpush1.bf16.msra.mxu1 %v1513_v43  ;;  %1355 = vmatpush3.bf16.msra.mxu0 %v1534_v61  ;;  %v1556_v43 = vld [vmem:[#allocation8 + $0x54] ss:$8 sps:$4 sm:$0xff]  }
  0xb6   : > { %772 = vmatprep.subr.bf16.mxu1 %v1514_v44  ;;  %1356 = vmatprep.subr.bf16.mxu0 %v1535_v16  ;;  %v1554_v44 = vld [vmem:[#allocation8 + $0x50] ss:$8 sps:$4 sm:$0xff]  }
  0xb9   : > { %773 = vmatpush1.bf16.msra.mxu1 %v1516_v45  ;;  %1357 = vmatpush3.bf16.msra.mxu0 %v1536_v17  ;;  %v1559_v45 = vld [vmem:[#allocation8 + $0x64] ss:$8 sps:$4 sm:$0xff]  }
  0xba   : > { %774 = vmatprep.subr.bf16.mxu1 %v1517_v46  ;;  %1358 = vmatprep.subr.bf16.mxu0 %v1537_v18  ;;  %v1562_v46 = vld [vmem:[#allocation8 + $0x74] ss:$8 sps:$4 sm:$0xff]  }
  0xbd   : > { %775 = vmatpush1.bf16.msra.mxu1 %v1519_v47  ;;  %1359 = vmatpush3.bf16.msra.mxu0 %v1538_v19  ;;  %v1560_v47 = vld [vmem:[#allocation8 + $0x70] ss:$8 sps:$4 sm:$0xff]  }
  0xbe   : > { %776 = vmatprep.subr.bf16.mxu1 %v1520_v48  ;;  %1076 = vmatprep.subr.bf16.mxu0 %v1541_v20 }
  0xc1   : > { %777 = vmatpush1.bf16.msra.mxu1 %v1522_v49  ;;  %v1303_v49 = vld [vmem:[%s2072_s6] ss:$0 sm:$0xff] }
 0x173   : > { %v531_v6 = vpop.f32.mrb[0].mxu0 }
 0x174   : > { %v532_v7 = vadd.f32 %v531_v6, %v410_v4  ;;  %v533_v8 = vpop.f32.mrb[1].mxu0 }
 0x175   : > { %v534_v9 = vadd.f32 %v533_v8, %v414_v5  ;;  %v535_v10 = vpop.f32.mrb[2].mxu0 }
 0x176   : > { %v538_v11 = vmax.f32 %v532_v7, 0.0  ;;  %v536_v12 = vpop.f32.mrb[3].mxu0 }
 0x177   : > { %v539_v13 = vmax.f32 %v534_v9, 0.0 }
 0x178   : > { %v540_v15 = vpack.c.bf16 %v538_v11, %v538_v11 }
 0x179   : > { %v541_v14 = vpack.c.bf16 %v539_v13, %v539_v13 }
 0x17b   : > { %778 = vmatprep.mubr.bf16.mxu1 %v541_v14 }
 0x17c   : > { %779 = vmatmul.mubr.bf16.vlgmr.msra.gmra.mrb[0].mxu1 %v540_v15 }
 0x24f   : > { %v780_v24 = vpop.f32.mrb[0].mxu1 }
 0x250   : > { %v781_v25 = vadd.f32 %v780_v24, %v579_v22  ;;  %v782_v26 = vpop.f32.mrb[1].mxu1 }
 0x251   : > { %v783_v27 = vadd.f32 %v782_v26, %v583_v23  ;;  %v784_v28 = vpop.f32.mrb[2].mxu1 }
 0x252   : > { %v787_v29 = vmax.f32 %v781_v25, 0.0  ;;  %v785_v30 = vpop.f32.mrb[3].mxu1 }
 0x253   : > { %v788_v31 = vmax.f32 %v783_v27, 0.0 }
 0x254   : > { %v789_v34 = vpack.c.bf16 %v787_v29, %v787_v29 }
 0x255   : > { %v790_v32 = vpack.c.bf16 %v788_v31, %v788_v31 }
 0x257   : > { %958 = vmatprep.mubr.bf16.mxu0 %v790_v32 }
 0x258   : > { %959 = vmatmul.mubr.bf16.vlgmr.msra.gmra.mrb[4].mxu0 %v789_v34 }
 0x259   : > { %1077 = vmatpush1.bf16.msra.mxu0 %v1539_v33  ;;  %1108 = vmatprep.mubr.bf16.mxu0 %v1759_v0  ;;  %v1557_v0 = vld [vmem:[#allocation8 + $0x60] ss:$8 sps:$4 sm:$0xff]  }
 0x25a   : > { %1078 = vmatprep.subr.bf16.mxu0 %v1544_v35 }
 0x25d   : > { %1079 = vmatpush1.bf16.msra.mxu0 %v1542_v36 }
 0x25e   : > { %1080 = vmatprep.subr.bf16.mxu0 %v1547_v37 }
 0x261   : > { %1081 = vmatpush1.bf16.msra.mxu0 %v1545_v38 }
 0x262   : > { %1082 = vmatprep.subr.bf16.mxu0 %v1550_v39 }
 0x265   : > { %1083 = vmatpush1.bf16.msra.mxu0 %v1548_v40 }
 0x266   : > { %1084 = vmatprep.subr.bf16.mxu0 %v1553_v41 }
 0x269   : > { %1085 = vmatpush1.bf16.msra.mxu0 %v1551_v42 }
 0x26a   : > { %1086 = vmatprep.subr.bf16.mxu0 %v1556_v43 }
 0x26d   : > { %1087 = vmatpush1.bf16.msra.mxu0 %v1554_v44 }
 0x26e   : > { %1088 = vmatprep.subr.bf16.mxu0 %v1559_v45 }
 0x271   : > { %1089 = vmatpush1.bf16.msra.mxu0 %v1557_v0 }
 0x272   : > { %1090 = vmatprep.subr.bf16.mxu0 %v1562_v46 }
 0x275   : > { %1091 = vmatpush1.bf16.msra.mxu0 %v1560_v47 }
 0x32b   : > { %v1360_v48 = vpop.f32.mrb[4].mxu0 }
 0x32c   : > { %v1361_v50 = vpop.f32.mrb[5].mxu0 }
 0x32d   : > { %v1362_v51 = vadd.f32 %v1361_v50, %v1360_v48  ;;  %v1363_v52 = vpop.f32.mrb[6].mxu0 }
 0x32e   : > { %v1364_v53 = vpop.f32.mrb[7].mxu0 }
 0x32f   : > { %v961_v54 = vadd.f32 %v1362_v51, %v1303_v49 }
 0x331   : > { %v966_v55 = vmax.f32 %v961_v54, 0.0 }
 0x333   : > { %v967_v56 = vpack.c.bf16 %v966_v55, %v966_v55 }
 0x335   : > { %1109 = vmatmul.mubr.bf16.vlgmr.msra.gmra.mrb[8].mxu0 %v967_v56 }
 0x408   : > { %v1110_v60 = vpop.f32.mrb[8].mxu0 }
 0x409   : > { %v1111_v61 = vadd.f32 %v1110_v60, %v989_v58  ;;  %v1112_v62 = vpop.f32.mrb[9].mxu0 }
 0x40a   : > { %v1113_v63 = vadd.f32 %v1112_v62, %v993_v59  ;;  %v1114_v2 = vpop.f32.mrb[10].mxu0 }
 0x40b   : > { %v1115_v4 = vpop.f32.mrb[11].mxu0 }
 0x40c   : > { %v1342_v5 = vpack.c.bf16 %v1113_v63, %v1111_v61 }
 0x40e   : > { %1125 = vst [vmem:[%s382_s16] sm:$0xff] %v1342_v5 }
 0x40f   : > { %1688 = shalt.err (!%p1685_p0)
}
 0x410   : > { %s1689_s25 = scalar_lea.hbm %s2024_s11, 128  ;;  %s1693_s23 = scalar_lea.hbm %s2075_s9, 256 }
 0x411   : > { %p1690_p10 = scmp.ne.s32.totalorder %s2024_s11, %s1689_s25  ;;  %p1694_p4 = scmp.lt.u32.totalorder %s2024_s11, %s2075_s9 }
 0x412   : > { %p1695_p12 = scmp.lt.u32.totalorder %s1693_s23, %s1689_s25  ;;  %p1697_p8 = scmp.lt.u32.totalorder %s1689_s25, %s2024_s11 }
 0x413   : > { %p1691_p2 = pnand %p1690_p10, %p2105_p11 }
 0x414   : > { %p1696_p7 = por %p1695_p12, %p1694_p4 }
 0x415   : > { %p1692_p3 = pneg %p1691_p2 }
 0x416   : > { %p1698_p13 = por %p1697_p8, %p1696_p7 }
 0x418   : > { %p1699_p1 = pnand %p1698_p13, %p1692_p3 }
 0x41a   : > { %1702 = shalt.err (!%p1699_p1)
}
 0x41b   : > { %1382 = dma.vmem_to_hbm [thread:$0]  (%p2105_p11), %s2026_s18, 128, %s2024_s11, %s1127_s15  }
 0x41c PF: > { %s2106_s30 = sld [smem:[#allocation15_spill]]  ;;  %s2107_s14 = sld [smem:[#allocation19_spill]] }
 0x41d   : > { %p1409_p6 = scmp.ge.s32.totalorder %s1749_s12, 2 }
 0x422   : > { %s1153_s16 = sand.u32 1, %s2106_s30   ;;  %p2108_p9 = scmp.ne.s32.totalorder %s2107_s14, 0 }
 0x423   : > { %s1154_s21 = scalar_lea.sflag [#allocation4], %s1153_s16 }
 0x424   : > { %p1398_p5 = pnand %p1409_p6, %p2108_p9 }
 0x426   : > { %1732 = dma.done.wait (!%p1398_p5), %s1154_s21, 128  }
 0x427   : > { %1734 = vsyncadd (!%p1398_p5), %s1154_s21, 4294967168  ;;  %s2109_s12 = sld [smem:[#allocation17_spill]]  ;;  %s2110_s24 = sld [smem:[#allocation16_spill]] }
 0x428   : > { %s2111_s11 = sld [smem:[#allocation18_spill]]  ;;  %s2112_s30 = smov %s1741_s10 }
 0x42d   : > { %p22_p0 = scmp.ge.s32.totalorder %s2109_s12, 4   ;;  %s2113_s10 = smov %s2110_s24 }
 0x42f   :  { %24 = sbr.rel (!%p22_p0) target bundleno = 6 (0x6), region = 108 }
 0x436   :  { %1159 = vsyncpa [#allocation3], 1 }
 0x437   :  { %1161 = vsyncpa [#allocation3 + $0x1], 1 }
 0x438   :  { %1162 = vsyncpa [#allocation6], 1 }
 0x439   :  { %1163 = vsyncpa [#allocation9], 1 }
 0x43a   :  { %1164 = vsyncpa [#allocation4], 1 }
 0x43b   :  { %1166 = vsyncpa [#allocation4 + $0x1], 1 }

</bundles_post_ra>
